<compile_context>
chip_gen: v7x
topology: tpu7x:2x2x1
jax: 0.10.0
libtpu: 0.0.40
codegen_flags: <defaults>
</compile_context>

<pallas_src>
import functools

import jax
import jax.numpy as jnp
from jax.experimental import pallas as pl
from jax.experimental.pallas import tpu as pltpu

HIDDEN = 256
N_PAD = 128            # lane-dense padded action width (multiple of 128)
DEFAULT_BLOCK_BATCH = 256   # batch tile: large enough for HBM roofline, small
                            # enough to fit v7x's 64 MiB VMEM at any total batch


def _round_up(x, m):
    return (x + m - 1) // m * m


def actor_ddpg_kernel(x_ref, w1_ref, b12_ref, w2_ref, w3_ref, sb3_ref, o_ref):
    # fc1 + relu  (bf16 MXU inputs, f32 accumulate)
    x = x_ref[...].astype(jnp.bfloat16)
    h1 = jnp.dot(x, w1_ref[...], preferred_element_type=jnp.float32)
    h1 = jnp.maximum(h1 + b12_ref[0:1, :], 0.0)                 # (tb, 256)

    # fc2 + relu
    h2 = jnp.dot(h1.astype(jnp.bfloat16), w2_ref[...],
                 preferred_element_type=jnp.float32)
    h2 = jnp.maximum(h2 + b12_ref[1:2, :], 0.0)                 # (tb, 256)

    # fc_mu + tanh  (lane-dense: padded to N_PAD output columns)
    mu = jnp.dot(h2.astype(jnp.bfloat16), w3_ref[...],
                 preferred_element_type=jnp.float32)
    mu = jnp.tanh(mu + sb3_ref[0:1, :])                         # (tb, N_PAD)

    # per-action-dim rescale: mu * action_scale + action_bias
    o_ref[...] = mu * sb3_ref[1:2, :] + sb3_ref[2:3, :]


@functools.partial(jax.jit, static_argnames=("act_dim", "block_batch"))
def actor_ddpg_forward(x, w1, b12, w2, w3p, sb3, *, act_dim,
                       block_batch=DEFAULT_BLOCK_BATCH):
    batch, obs_dim = x.shape
    n_pad = w3p.shape[1]

    # batch tile: multiple of 8 sublanes, capped at block_batch
    tb = min(block_batch, _round_up(batch, 8))
    b_pad = _round_up(batch, tb)
    if b_pad != batch:
        x = jnp.pad(x, ((0, b_pad - batch), (0, 0)))

    out = pl.pallas_call(
        actor_ddpg_kernel,
        out_shape=jax.ShapeDtypeStruct((b_pad, n_pad), jnp.float32),
        grid=(b_pad // tb,),
        in_specs=[
            pl.BlockSpec((tb, obs_dim), lambda i: (i, 0)),       # x: streamed
            pl.BlockSpec((obs_dim, HIDDEN), lambda i: (0, 0)),   # W1: resident
            pl.BlockSpec((2, HIDDEN), lambda i: (0, 0)),         # [b1; b2]
            pl.BlockSpec((HIDDEN, HIDDEN), lambda i: (0, 0)),    # W2: resident
            pl.BlockSpec((HIDDEN, n_pad), lambda i: (0, 0)),     # W3 (padded)
            pl.BlockSpec((3, n_pad), lambda i: (0, 0)),          # [b3; scale; bias]
        ],
        out_specs=pl.BlockSpec((tb, n_pad), lambda i: (i, 0)),   # lane-dense out
        compiler_params=pltpu.CompilerParams(
            dimension_semantics=("parallel",)),
    )(x, w1, b12, w2, w3p, sb3)

    return out[:batch, :act_dim]


def init_params(key, obs_dim, act_dim):
    """Deterministic init mimicking nn.Linear's U(-1/sqrt(fan_in), +1/sqrt(fan_in))."""
    def linear(key, fan_in, fan_out):
        kw, kb = jax.random.split(key)
        bound = 1.0 / jnp.sqrt(jnp.float32(fan_in))
        # stored (in, out) == transpose of PyTorch's (out, in) weight
        w = jax.random.uniform(kw, (fan_in, fan_out), jnp.float32, -bound, bound)
        b = jax.random.uniform(kb, (fan_out,), jnp.float32, -bound, bound)
        return w, b

    k1, k2, k3 = jax.random.split(key, 3)
    w1, b1 = linear(k1, obs_dim, HIDDEN)
    w2, b2 = linear(k2, HIDDEN, HIDDEN)
    w3, b3 = linear(k3, HIDDEN, act_dim)
    return (w1, b1, w2, b2, w3, b3)


def pack_params(params, action_scale, action_bias, act_dim):
    """bf16 weights, consolidated small operands, lane-dense padded last layer."""
    w1, b1, w2, b2, w3, b3 = params
    hidden = w1.shape[1]
    n_pad = _round_up(max(act_dim, N_PAD), 128)

    b12 = jnp.stack([b1.reshape(hidden), b2.reshape(hidden)], 0).astype(jnp.float32)

    w3p = jnp.zeros((hidden, n_pad), jnp.float32).at[:, :act_dim].set(w3)

    scale_v = jnp.broadcast_to(
        jnp.asarray(action_scale, jnp.float32).reshape(-1), (act_dim,))
    bias_v = jnp.broadcast_to(
        jnp.asarray(action_bias, jnp.float32).reshape(-1), (act_dim,))
    sb3 = jnp.zeros((3, n_pad), jnp.float32)
    sb3 = sb3.at[0, :act_dim].set(b3.reshape(-1))
    sb3 = sb3.at[1, :act_dim].set(scale_v)
    sb3 = sb3.at[2, :act_dim].set(bias_v)

    return (w1.astype(jnp.bfloat16), b12, w2.astype(jnp.bfloat16),
            w3p.astype(jnp.bfloat16), sb3)


def reference_forward(x, params, action_scale, action_bias):
    """Pure-JAX f32 reference of the PyTorch forward."""
    w1, b1, w2, b2, w3, b3 = params
    h = jax.nn.relu(x @ w1 + b1[None, :])
    h = jax.nn.relu(h @ w2 + b2[None, :])
    mu = jnp.tanh(h @ w3 + b3[None, :])
    return mu * jnp.asarray(action_scale) + jnp.asarray(action_bias)


if __name__ == "__main__":
    key = jax.random.PRNGKey(0)
    k_params, k_x = jax.random.split(key)

    batch = 8
    obs_dim = 16   # env.single_observation_space.shape -> prod
    act_dim = 4    # env.single_action_space.shape -> prod

    params = init_params(k_params, obs_dim, act_dim)
    x = jax.random.normal(k_x, (batch, obs_dim), jnp.float32)

    # module buffers: action_scale = 2/2.0 = 1.0, action_bias = 0/2.0 = 0.0
    # (the packed layout also supports per-action-dim vectors)
    action_scale = jnp.float32(1.0)
    action_bias = jnp.float32(0.0)

    packed = pack_params(params, action_scale, action_bias, act_dim)
    out = actor_ddpg_forward(x, *packed, act_dim=act_dim)
    out = jax.block_until_ready(out)

    ref = reference_forward(x, params, action_scale, action_bias)
    assert out.shape == (batch, act_dim)
    max_err = float(jnp.max(jnp.abs(out - ref)))
    # bf16 weights/activations on the MXU vs f32 reference -> ~1e-3..1e-2 error
    assert max_err < 5e-2, f"mismatch vs reference: max abs err {max_err}"

    print("KERNEL_OK")
</pallas_src>

<mosaic_0001>
module attributes {stable_mosaic.version = 11 : i64} {
  func.func @actor_ddpg_kernel(%arg0: i32, %arg1: memref<8x16xf32, #tpu.memory_space<vmem>>, %arg2: memref<16x256xbf16, #tpu.memory_space<vmem>>, %arg3: memref<2x256xf32, #tpu.memory_space<vmem>>, %arg4: memref<256x256xbf16, #tpu.memory_space<vmem>>, %arg5: memref<256x128xbf16, #tpu.memory_space<vmem>>, %arg6: memref<3x128xf32, #tpu.memory_space<vmem>>, %arg7: memref<8x128xf32, #tpu.memory_space<vmem>>) attributes {dimension_semantics = [#tpu.dimension_semantics<parallel>], iteration_bounds = array<i64: 1>, scalar_prefetch = 0 : i64, scratch_operands = 0 : i64, tpu.core_type = #tpu.core_type<tc>, window_params = [{transform_indices = @transform_0, window_bounds = array<i64: 8, 16>}, {pipeline_mode = #tpu.pipeline_mode<synchronous>, transform_indices = @transform_1, window_bounds = array<i64: 16, 256>}, {pipeline_mode = #tpu.pipeline_mode<synchronous>, transform_indices = @transform_2, window_bounds = array<i64: 2, 256>}, {pipeline_mode = #tpu.pipeline_mode<synchronous>, transform_indices = @transform_3, window_bounds = array<i64: 256, 256>}, {pipeline_mode = #tpu.pipeline_mode<synchronous>, transform_indices = @transform_4, window_bounds = array<i64: 256, 128>}, {pipeline_mode = #tpu.pipeline_mode<synchronous>, transform_indices = @transform_5, window_bounds = array<i64: 3, 128>}, {transform_indices = @transform_6, window_bounds = array<i64: 8, 128>}]} {
    %c0 = arith.constant 0 : index
    %c0_0 = arith.constant 0 : index
    %0 = vector.load %arg1[%c0, %c0_0] : memref<8x16xf32, #tpu.memory_space<vmem>>, vector<8x16xf32>
    %1 = arith.truncf %0 : vector<8x16xf32> to vector<8x16xbf16>
    %c0_1 = arith.constant 0 : index
    %c0_2 = arith.constant 0 : index
    %2 = vector.load %arg2[%c0_1, %c0_2] : memref<16x256xbf16, #tpu.memory_space<vmem>>, vector<16x256xbf16>
    %cst = arith.constant dense<0.000000e+00> : vector<8x256xf32>
    %3 = tpu.matmul %1, %2, %cst {dimension_numbers = #tpu.dot_dimension_numbers<[1], [0], [0], [1], [0, 0, 1, 1], [], []>} : vector<8x16xbf16>, vector<16x256xbf16>, vector<8x256xf32> -> vector<8x256xf32>
    %c0_3 = arith.constant 0 : index
    %c0_4 = arith.constant 0 : index
    %4 = vector.load %arg3[%c0_3, %c0_4] : memref<2x256xf32, #tpu.memory_space<vmem>>, vector<1x256xf32>
    %5 = vector.broadcast %4 : vector<1x256xf32> to vector<8x256xf32>
    %6 = arith.addf %3, %5 : vector<8x256xf32>
    %cst_5 = arith.constant 0.000000e+00 : f32
    %7 = vector.broadcast %cst_5 : f32 to vector<8x256xf32>
    %8 = arith.maximumf %6, %7 : vector<8x256xf32>
    %9 = arith.truncf %8 : vector<8x256xf32> to vector<8x256xbf16>
    %c0_6 = arith.constant 0 : index
    %c0_7 = arith.constant 0 : index
    %10 = vector.load %arg4[%c0_6, %c0_7] : memref<256x256xbf16, #tpu.memory_space<vmem>>, vector<256x256xbf16>
    %cst_8 = arith.constant dense<0.000000e+00> : vector<8x256xf32>
    %11 = tpu.matmul %9, %10, %cst_8 {dimension_numbers = #tpu.dot_dimension_numbers<[1], [0], [0], [1], [0, 0, 1, 1], [], []>} : vector<8x256xbf16>, vector<256x256xbf16>, vector<8x256xf32> -> vector<8x256xf32>
    %c1 = arith.constant 1 : index
    %c0_9 = arith.constant 0 : index
    %12 = vector.load %arg3[%c1, %c0_9] : memref<2x256xf32, #tpu.memory_space<vmem>>, vector<1x256xf32>
    %13 = vector.broadcast %12 : vector<1x256xf32> to vector<8x256xf32>
    %14 = arith.addf %11, %13 : vector<8x256xf32>
    %cst_10 = arith.constant 0.000000e+00 : f32
    %15 = vector.broadcast %cst_10 : f32 to vector<8x256xf32>
    %16 = arith.maximumf %14, %15 : vector<8x256xf32>
    %17 = arith.truncf %16 : vector<8x256xf32> to vector<8x256xbf16>
    %c0_11 = arith.constant 0 : index
    %c0_12 = arith.constant 0 : index
    %18 = vector.load %arg5[%c0_11, %c0_12] : memref<256x128xbf16, #tpu.memory_space<vmem>>, vector<256x128xbf16>
    %cst_13 = arith.constant dense<0.000000e+00> : vector<8x128xf32>
    %19 = tpu.matmul %17, %18, %cst_13 {dimension_numbers = #tpu.dot_dimension_numbers<[1], [0], [0], [1], [0, 0, 1, 1], [], []>} : vector<8x256xbf16>, vector<256x128xbf16>, vector<8x128xf32> -> vector<8x128xf32>
    %c0_14 = arith.constant 0 : index
    %c0_15 = arith.constant 0 : index
    %20 = vector.load %arg6[%c0_14, %c0_15] : memref<3x128xf32, #tpu.memory_space<vmem>>, vector<1x128xf32>
    %21 = vector.broadcast %20 : vector<1x128xf32> to vector<8x128xf32>
    %22 = arith.addf %19, %21 : vector<8x128xf32>
    %23 = math.tanh %22 : vector<8x128xf32>
    %c1_16 = arith.constant 1 : index
    %c0_17 = arith.constant 0 : index
    %24 = vector.load %arg6[%c1_16, %c0_17] : memref<3x128xf32, #tpu.memory_space<vmem>>, vector<1x128xf32>
    %25 = vector.broadcast %24 : vector<1x128xf32> to vector<8x128xf32>
    %26 = arith.mulf %23, %25 : vector<8x128xf32>
    %c2 = arith.constant 2 : index
    %c0_18 = arith.constant 0 : index
    %27 = vector.load %arg6[%c2, %c0_18] : memref<3x128xf32, #tpu.memory_space<vmem>>, vector<1x128xf32>
    %28 = vector.broadcast %27 : vector<1x128xf32> to vector<8x128xf32>
    %29 = arith.addf %26, %28 : vector<8x128xf32>
    %c0_19 = arith.constant 0 : index
    %c0_20 = arith.constant 0 : index
    %30 = vector.load %arg7[%c0_19, %c0_20] : memref<8x128xf32, #tpu.memory_space<vmem>>, vector<8x128xf32>
    tpu.vector_store %arg7[%c0_19, %c0_20], %29 {strides = array<i32>} : memref<8x128xf32, #tpu.memory_space<vmem>>, vector<8x128xf32>,
    return
  }
  func.func @transform_0(%arg0: i32) -> (i32, i32) {
    %c0_i32 = arith.constant 0 : i32
    %c0_i32_0 = arith.constant 0 : i32
    return %arg0, %c0_i32 : i32, i32
  }
  func.func @transform_1(%arg0: i32) -> (i32, i32) {
    %c0_i32 = arith.constant 0 : i32
    %c0_i32_0 = arith.constant 0 : i32
    %c0_i32_1 = arith.constant 0 : i32
    return %c0_i32, %c0_i32_0 : i32, i32
  }
  func.func @transform_2(%arg0: i32) -> (i32, i32) {
    %c0_i32 = arith.constant 0 : i32
    %c0_i32_0 = arith.constant 0 : i32
    %c0_i32_1 = arith.constant 0 : i32
    return %c0_i32, %c0_i32_0 : i32, i32
  }
  func.func @transform_3(%arg0: i32) -> (i32, i32) {
    %c0_i32 = arith.constant 0 : i32
    %c0_i32_0 = arith.constant 0 : i32
    %c0_i32_1 = arith.constant 0 : i32
    return %c0_i32, %c0_i32_0 : i32, i32
  }
  func.func @transform_4(%arg0: i32) -> (i32, i32) {
    %c0_i32 = arith.constant 0 : i32
    %c0_i32_0 = arith.constant 0 : i32
    %c0_i32_1 = arith.constant 0 : i32
    return %c0_i32, %c0_i32_0 : i32, i32
  }
  func.func @transform_5(%arg0: i32) -> (i32, i32) {
    %c0_i32 = arith.constant 0 : i32
    %c0_i32_0 = arith.constant 0 : i32
    %c0_i32_1 = arith.constant 0 : i32
    return %c0_i32, %c0_i32_0 : i32, i32
  }
  func.func @transform_6(%arg0: i32) -> (i32, i32) {
    %c0_i32 = arith.constant 0 : i32
    %c0_i32_0 = arith.constant 0 : i32
    return %arg0, %c0_i32 : i32, i32
  }
}

</mosaic_0001>

<bundles_post_ra>
// kernel: actor_ddpg_forward.1
= control target key start
LH: loop header
LB: loop body
LE: loop exit
PB: predicated region body
PF: predicated region fallthrough
CT: control target
= control target key end

     0   :  { %11 = vsyncpa [#allocation3], 0  ;;  %s961_s0 = inlined_call_operand.hbm [shape: f32[8,16], index: 0, kind: input, shape index: {}]   ;;  %s962_s1 = inlined_call_operand.hbm [shape: bf16[16,256], index: 1, kind: input, shape index: {}]   ;;  %s963_s2 = inlined_call_operand.vmem [shape: f32[2,256], index: 2, kind: input, shape index: {}]   ;;  %s964_s3 = inlined_call_operand.hbm [shape: bf16[256,256], index: 3, kind: input, shape index: {}]   ;;  %s965_s4 = inlined_call_operand.hbm [shape: bf16[256,128], index: 4, kind: input, shape index: {}]   ;;  %s966_s5 = inlined_call_operand.vmem [shape: f32[3,128], index: 5, kind: input, shape index: {}]   ;;  %s967_s6 = inlined_call_operand.vmem [shape: f32[8,128], index: 6, kind: output, shape index: {}]  }
   0x1   :  { %12 = vsyncpa [#allocation5], 0 }
   0x2   :  { %13 = vsyncpa [#allocation8], 0  ;;  %s845_s21 = smov [#allocation4]   ;;  %s751_s25 = scalar_lea.hbm %s962_s1, 256 }
   0x3   :  { %s29_s22 = sshll.u32 %s845_s21, 4  ;;  %p752_p0 = scmp.ne.s32.totalorder %s962_s1, %s751_s25  ;;  %s30_s22 = int_to_ptr.vmem [resolvable:$true] %s29_s22 }
   0x4   :  { %p755_p1 = scmp.lt.u32.totalorder %s751_s25, %s962_s1 }
   0x6   :  { %p757_p2 = pnand %p755_p1, %p752_p0 }
   0x8   :  { %760 = shalt.err (!%p757_p2)
}
   0x9   :  { %s761_s30 = scalar_lea.vmem %s30_s22, 256  ;;  %p766_p4 = scmp.lt.s32.totalorder %s30_s22, %s30_s22 }
   0xa   :  { %p762_p3 = scmp.ne.s32.totalorder %s30_s22, %s761_s30  ;;  %p767_p5 = scmp.lt.s32.totalorder %s761_s30, %s761_s30 }
   0xc   :  { %p768_p6 = por %p767_p5, %p766_p4 }
   0xe   :  { %p769_p7 = pnand %p768_p6, %p762_p3 }
  0x10   :  { %772 = shalt.err (!%p769_p7)
}
  0x11   :  { %s846_s7 = smov 128   ;;  %s847_s8 = smov 8  }
  0x12   :  { %35 = dma.hbm_to_vmem [thread:$0]  %s962_s1, 256, %s30_s22, [#allocation5], %s846_s7, %s846_s7, %s847_s8  }
  0x13   :  { %s848_s11 = smov [#allocation2]   ;;  %s849_s13 = smov [#allocation6]  }
  0x14   :  { %s20_s12 = sshll.u32 %s848_s11, 4  ;;  %s43_s14 = sshll.u32 %s849_s13, 4  ;;  %s21_s12 = int_to_ptr.vmem [resolvable:$true] %s20_s12  ;;  %s44_s14 = int_to_ptr.vmem [resolvable:$true] %s43_s14 }
  0x15   :  { %s773_s17 = scalar_lea.hbm %s961_s0, 128 }
  0x16   :  { %p774_p8 = scmp.ne.s32.totalorder %s961_s0, %s773_s17  ;;  %p777_p9 = scmp.lt.u32.totalorder %s773_s17, %s961_s0 }
  0x18   :  { %p779_p10 = pnand %p777_p9, %p774_p8 }
  0x1a   :  { %782 = shalt.err (!%p779_p10)
}
  0x1b   :  { %s783_s1 = scalar_lea.vmem %s21_s12, 128  ;;  %p788_p12 = scmp.lt.s32.totalorder %s21_s12, %s21_s12 }
  0x1c   :  { %p784_p11 = scmp.ne.s32.totalorder %s21_s12, %s783_s1  ;;  %p789_p13 = scmp.lt.s32.totalorder %s783_s1, %s783_s1 }
  0x1e   :  { %p790_p0 = por %p789_p13, %p788_p12 }
  0x20   :  { %p791_p1 = pnand %p790_p0, %p784_p11 }
  0x22   :  { %794 = shalt.err (!%p791_p1)
}
  0x23   :  { %23 = dma.hbm_to_vmem [thread:$0]  %s961_s0, 128, %s21_s12, [#allocation3]  }
  0x24   :  { %s795_s26 = scalar_lea.hbm %s964_s3, 4096 }
  0x25   :  { %p796_p2 = scmp.ne.s32.totalorder %s964_s3, %s795_s26  ;;  %p799_p3 = scmp.lt.u32.totalorder %s795_s26, %s964_s3 }
  0x27   :  { %p801_p4 = pnand %p799_p3, %p796_p2 }
  0x29   :  { %804 = shalt.err (!%p801_p4)
}
  0x2a   :  { %s805_s9 = scalar_lea.vmem %s44_s14, 4096  ;;  %p810_p6 = scmp.lt.s32.totalorder %s44_s14, %s44_s14 }
  0x2b   :  { %p806_p5 = scmp.ne.s32.totalorder %s44_s14, %s805_s9  ;;  %p811_p7 = scmp.lt.s32.totalorder %s805_s9, %s805_s9 }
  0x2d   :  { %p812_p8 = por %p811_p7, %p810_p6 }
  0x2f   :  { %p813_p9 = pnand %p812_p8, %p806_p5 }
  0x31   :  { %816 = shalt.err (!%p813_p9)
}
  0x32   :  { %49 = dma.hbm_to_vmem [thread:$0]  %s964_s3, 4096, %s44_s14, [#allocation5], %s846_s7, %s846_s7, %s847_s8  }
  0x33   :  { %s850_s11 = smov [#allocation7]   ;;  %s817_s16 = scalar_lea.hbm %s965_s4, 2048 }
  0x34   :  { %s55_s12 = sshll.u32 %s850_s11, 4  ;;  %p818_p10 = scmp.ne.s32.totalorder %s965_s4, %s817_s16  ;;  %s56_s12 = int_to_ptr.vmem [resolvable:$true] %s55_s12 }
  0x35   :  { %p821_p11 = scmp.lt.u32.totalorder %s817_s16, %s965_s4 }
  0x37   :  { %p823_p12 = pnand %p821_p11, %p818_p10 }
  0x39   :  { %826 = shalt.err (!%p823_p12)
}
  0x3a   :  { %s827_s21 = scalar_lea.vmem %s56_s12, 2048  ;;  %p832_p0 = scmp.lt.s32.totalorder %s56_s12, %s56_s12 }
  0x3b   :  { %p828_p13 = scmp.ne.s32.totalorder %s56_s12, %s827_s21  ;;  %p833_p1 = scmp.lt.s32.totalorder %s827_s21, %s827_s21 }
  0x3d   :  { %p834_p2 = por %p833_p1, %p832_p0 }
  0x3f   :  { %p835_p3 = pnand %p834_p2, %p828_p13 }
  0x41   :  { %838 = shalt.err (!%p835_p3)
}
  0x42   :  { %s851_s3 = smov 64   ;;  %s852_s7 = smov 4  }
  0x43   :  { %61 = dma.hbm_to_vmem [thread:$0]  %s965_s4, 2048, %s56_s12, [#allocation8], %s851_s3, %s851_s3, %s852_s7  }
  0x44   :  { %839 = dma.done.wait [#allocation3], 128  }
  0x45   :  { %840 = vsyncadd [#allocation3], 4294967168 }
  0x46   :  { %841 = dma.done.wait [#allocation5], 4352  }
  0x47   :  { %842 = vsyncadd [#allocation5], 4294962944 }
  0x48   :  { %843 = dma.done.wait [#allocation8], 2048  }
  0x49   :  { %844 = vsyncadd [#allocation8], 4294965248  ;;  %v853_v0 = vmov 0   ;;  %v682_v1 = vld [vmem:[#allocation4 + $0x4] ss:$8 sps:$4 sm:$0xff]   ;;  %v77_v3 = vld [vmem:[#allocation2] sm:$0xff]  ;;  %v83_v49 = vlaneseq }
  0x4a   :  { %139 = vmatprep.mubr.bf16.mxu0 %v853_v0  ;;  %v684_v2 = vld [vmem:[#allocation4] ss:$8 sps:$4 sm:$0xff]   ;;  %107 = vmatprep.subr.bf16.mxu0 %v682_v1  ;;  %v78_v4 = vpack.c.bf16 %v77_v3, %v77_v3  ;;  %v685_v5 = vld [vmem:[#allocation6 + $0x4] ss:$8 sps:$4 sm:$0xff]   ;;  %v687_v6 = vld [vmem:[#allocation6] ss:$8 sps:$4 sm:$0xff]  }
  0x4b   :  { %108 = vmatpush1.bf16.msra.mxu0 %v684_v2  ;;  %vm103_vm0 = vcmask 130048   ;;  %v688_v7 = vld [vmem:[#allocation6 + $0x14] ss:$8 sps:$4 sm:$0xff]   ;;  %357 = vmatprep.subr.bf16.mxu1 %v685_v5  ;;  %v690_v8 = vld [vmem:[#allocation6 + $0x10] ss:$8 sps:$4 sm:$0xff]   ;;  %v733_v37 = vld [vmem:[#allocation7 + $0x40] sm:$0xff]  }
  0x4c   :  { %358 = vmatpush1.bf16.msra.mxu1 %v687_v6  ;;  %v691_v9 = vld [vmem:[#allocation6 + $0x24] ss:$8 sps:$4 sm:$0xff]   ;;  %v693_v10 = vld [vmem:[#allocation6 + $0x20] ss:$8 sps:$4 sm:$0xff]   ;;  %v694_v11 = vld [vmem:[#allocation6 + $0x34] ss:$8 sps:$4 sm:$0xff]   ;;  %651 = vmatprep.subr.bf16.mxu0 %v733_v37 }
  0x4d   :  { %359 = vmatprep.subr.bf16.mxu1 %v688_v7  ;;  %v696_v12 = vld [vmem:[#allocation6 + $0x30] ss:$8 sps:$4 sm:$0xff]   ;;  %v697_v13 = vld [vmem:[#allocation6 + $0x44] ss:$8 sps:$4 sm:$0xff]   ;;  %v699_v14 = vld [vmem:[#allocation6 + $0x40] ss:$8 sps:$4 sm:$0xff]  }
  0x4e   :  { %598 = vmatmul.mubr.msk.bf16.vlgmr.msra.gmra.mrb[0].mxu0 %vm103_vm0, %v78_v4  ;;  %v700_v15 = vld [vmem:[#allocation6 + $0x54] ss:$8 sps:$4 sm:$0xff]   ;;  %v702_v16 = vld [vmem:[#allocation6 + $0x50] ss:$8 sps:$4 sm:$0xff]   ;;  %v703_v17 = vld [vmem:[#allocation6 + $0x64] ss:$8 sps:$4 sm:$0xff]  }
  0x4f   :  { %v705_v18 = vld [vmem:[#allocation6 + $0x60] ss:$8 sps:$4 sm:$0xff]   ;;  %v706_v19 = vld [vmem:[#allocation6 + $0x74] ss:$8 sps:$4 sm:$0xff]   ;;  %v708_v20 = vld [vmem:[#allocation6 + $0x70] ss:$8 sps:$4 sm:$0xff]  }
  0x50   :  { %360 = vmatpush1.bf16.msra.mxu1 %v690_v8  ;;  %v709_v21 = vld [vmem:[#allocation6 + $0x84] ss:$8 sps:$4 sm:$0xff]   ;;  %v711_v22 = vld [vmem:[#allocation6 + $0x80] ss:$8 sps:$4 sm:$0xff]   ;;  %v712_v23 = vld [vmem:[#allocation6 + $0x94] ss:$8 sps:$4 sm:$0xff]  }
  0x51   :  { %361 = vmatprep.subr.bf16.mxu1 %v691_v9  ;;  %v714_v24 = vld [vmem:[#allocation6 + $0x90] ss:$8 sps:$4 sm:$0xff]   ;;  %v715_v25 = vld [vmem:[#allocation6 + $0xa4] ss:$8 sps:$4 sm:$0xff]   ;;  %v717_v26 = vld [vmem:[#allocation6 + $0xa0] ss:$8 sps:$4 sm:$0xff]  }
  0x52   :  { %v718_v27 = vld [vmem:[#allocation6 + $0xb4] ss:$8 sps:$4 sm:$0xff]   ;;  %v720_v28 = vld [vmem:[#allocation6 + $0xb0] ss:$8 sps:$4 sm:$0xff]   ;;  %v721_v29 = vld [vmem:[#allocation6 + $0xc4] ss:$8 sps:$4 sm:$0xff]  }
  0x53   :  { %v723_v30 = vld [vmem:[#allocation6 + $0xc0] ss:$8 sps:$4 sm:$0xff]   ;;  %v724_v31 = vld [vmem:[#allocation6 + $0xd4] ss:$8 sps:$4 sm:$0xff]   ;;  %v726_v32 = vld [vmem:[#allocation6 + $0xd0] ss:$8 sps:$4 sm:$0xff]  }
  0x54   :  { %362 = vmatpush1.bf16.msra.mxu1 %v693_v10  ;;  %v727_v33 = vld [vmem:[#allocation6 + $0xe4] ss:$8 sps:$4 sm:$0xff]   ;;  %v729_v34 = vld [vmem:[#allocation6 + $0xe0] ss:$8 sps:$4 sm:$0xff]   ;;  %v730_v35 = vld [vmem:[#allocation6 + $0xf4] ss:$8 sps:$4 sm:$0xff]  }
  0x55   :  { %363 = vmatprep.subr.bf16.mxu1 %v694_v11  ;;  %v732_v36 = vld [vmem:[#allocation6 + $0xf0] ss:$8 sps:$4 sm:$0xff]   ;;  %v734_v38 = vld [vmem:[#allocation7] sm:$0xff]   ;;  %v735_v39 = vld [vmem:[#allocation7 + $0x48] sm:$0xff]   ;;  %v84_v50 = vshrl.u32 %v83_v49, 7 }
  0x56   :  { %652 = vmatpush3.bf16.msra.mxu0 %v734_v38  ;;  %v736_v40 = vld [vmem:[#allocation7 + $0x8] sm:$0xff]   ;;  %v737_v41 = vld [vmem:[#allocation7 + $0x50] sm:$0xff]   ;;  %v739_v43 = vld [vmem:[#allocation7 + $0x58] sm:$0xff]  }
  0x57   :  { %653 = vmatprep.subr.bf16.mxu0 %v735_v39  ;;  %v738_v42 = vld [vmem:[#allocation7 + $0x10] sm:$0xff]   ;;  %v740_v44 = vld [vmem:[#allocation7 + $0x18] sm:$0xff]   ;;  %v741_v45 = vld [vmem:[#allocation7 + $0x60] sm:$0xff]   ;;  %v85_v51 = vsub.s32 0, %v84_v50  ;;  %v89_v53 = vsub.s32 1, %v84_v50 }
  0x58   :  { %364 = vmatpush1.bf16.msra.mxu1 %v696_v12  ;;  %v742_v46 = vld [vmem:[#allocation7 + $0x20] sm:$0xff]   ;;  %v743_v47 = vld [vmem:[#allocation7 + $0x68] sm:$0xff]   ;;  %v745_v2 = vld [vmem:[#allocation7 + $0x70] sm:$0xff]  }
  0x59   :  { %365 = vmatprep.subr.bf16.mxu1 %v697_v13  ;;  %v744_v48 = vld [vmem:[#allocation7 + $0x28] sm:$0xff]   ;;  %v746_v3 = vld [vmem:[#allocation7 + $0x30] sm:$0xff]   ;;  %v747_v4 = vld [vmem:[#allocation7 + $0x78] sm:$0xff]  }
  0x5a   :  { %654 = vmatpush3.bf16.msra.mxu0 %v736_v40  ;;  %v81_v52 = vld [vmem:[%s963_s2] ss:$2 sm:$0x3]  ;;  %v748_v5 = vld [vmem:[#allocation7 + $0x38] sm:$0xff]  }
  0x5b   :  { %655 = vmatprep.subr.bf16.mxu0 %v737_v41  ;;  %v86_v54 = vrot.slane %v81_v52, %v85_v51  ;;  %v90_v55 = vrot.slane %v81_v52, %v89_v53  ;;  %v599_v6 = vld [vmem:[%s963_s2 + $0x1] ss:$2 sm:$0x3] }
  0x5c   :  { %366 = vmatpush1.bf16.msra.mxu1 %v699_v14  ;;  %v190_v7 = vrot.slane %v599_v6, %v85_v51  ;;  %v194_v8 = vrot.slane %v599_v6, %v89_v53 }
  0x5d   :  { %367 = vmatprep.subr.bf16.mxu1 %v700_v15 }
  0x5e   :  { %656 = vmatpush3.bf16.msra.mxu0 %v738_v42 }
  0x5f   :  { %657 = vmatprep.subr.bf16.mxu0 %v739_v43 }
  0x60   :  { %368 = vmatpush1.bf16.msra.mxu1 %v702_v16 }
  0x61   :  { %369 = vmatprep.subr.bf16.mxu1 %v703_v17 }
  0x62   :  { %658 = vmatpush3.bf16.msra.mxu0 %v740_v44 }
  0x63   :  { %659 = vmatprep.subr.bf16.mxu0 %v741_v45 }
  0x64   :  { %370 = vmatpush1.bf16.msra.mxu1 %v705_v18 }
  0x65   :  { %371 = vmatprep.subr.bf16.mxu1 %v706_v19 }
  0x66   :  { %660 = vmatpush3.bf16.msra.mxu0 %v742_v46 }
  0x67   :  { %661 = vmatprep.subr.bf16.mxu0 %v743_v47 }
  0x68   :  { %372 = vmatpush1.bf16.msra.mxu1 %v708_v20  ;;  %v632_v20 = vld [vmem:[%s966_s5] ss:$0 sm:$0xff] }
  0x69   :  { %373 = vmatprep.subr.bf16.mxu1 %v709_v21 }
  0x6a   :  { %662 = vmatpush3.bf16.msra.mxu0 %v744_v48 }
  0x6b   :  { %663 = vmatprep.subr.bf16.mxu0 %v745_v2 }
  0x6c   :  { %374 = vmatpush1.bf16.msra.mxu1 %v711_v22 }
  0x6d   :  { %375 = vmatprep.subr.bf16.mxu1 %v712_v23 }
  0x6e   :  { %664 = vmatpush3.bf16.msra.mxu0 %v746_v3 }
  0x6f   :  { %665 = vmatprep.subr.bf16.mxu0 %v747_v4 }
  0x70   :  { %376 = vmatpush1.bf16.msra.mxu1 %v714_v24 }
  0x71   :  { %377 = vmatprep.subr.bf16.mxu1 %v715_v25 }
  0x72   :  { %666 = vmatpush3.bf16.msra.mxu0 %v748_v5 }
  0x74   :  { %378 = vmatpush1.bf16.msra.mxu1 %v717_v26  ;;  %v649_v26 = vld [vmem:[%s966_s5 + $0x1] ss:$0 sm:$0xff] }
  0x75   :  { %379 = vmatprep.subr.bf16.mxu1 %v718_v27 }
  0x78   :  { %380 = vmatpush1.bf16.msra.mxu1 %v720_v28  ;;  %v650_v28 = vld [vmem:[%s966_s5 + $0x2] ss:$0 sm:$0xff] }
  0x79   :  { %381 = vmatprep.subr.bf16.mxu1 %v721_v29 }
  0x7c   :  { %382 = vmatpush1.bf16.msra.mxu1 %v723_v30 }
  0x7d   :  { %383 = vmatprep.subr.bf16.mxu1 %v724_v31 }
  0x80   :  { %384 = vmatpush1.bf16.msra.mxu1 %v726_v32 }
  0x81   :  { %385 = vmatprep.subr.bf16.mxu1 %v727_v33 }
  0x84   :  { %386 = vmatpush1.bf16.msra.mxu1 %v729_v34 }
  0x85   :  { %387 = vmatprep.subr.bf16.mxu1 %v730_v35 }
  0x88   :  { %388 = vmatpush1.bf16.msra.mxu1 %v732_v36 }
 0x121   :  { %v141_v56 = vpop.f32.mrb[0].mxu0 }
 0x122   :  { %v142_v57 = vadd.f32 %v141_v56, %v86_v54  ;;  %v143_v58 = vpop.f32.mrb[1].mxu0 }
 0x123   :  { %v144_v59 = vadd.f32 %v143_v58, %v90_v55  ;;  %v145_v60 = vpop.f32.mrb[2].mxu0 }
 0x124   :  { %v148_v61 = vmax.f32 %v142_v57, 0.0  ;;  %v146_v62 = vpop.f32.mrb[3].mxu0 }
 0x125   :  { %v149_v63 = vmax.f32 %v144_v59, 0.0 }
 0x126   :  { %v150_v1 = vpack.c.bf16 %v148_v61, %v148_v61 }
 0x127   :  { %v151_v0 = vpack.c.bf16 %v149_v63, %v149_v63 }
 0x129   :  { %389 = vmatprep.mubr.bf16.mxu1 %v151_v0 }
 0x12a   :  { %390 = vmatmul.mubr.bf16.vlgmr.msra.gmra.mrb[0].mxu1 %v150_v1 }
 0x1fd   :  { %v391_v9 = vpop.f32.mrb[0].mxu1 }
 0x1fe   :  { %v392_v10 = vadd.f32 %v391_v9, %v190_v7  ;;  %v393_v11 = vpop.f32.mrb[1].mxu1 }
 0x1ff   :  { %v394_v12 = vadd.f32 %v393_v11, %v194_v8  ;;  %v395_v13 = vpop.f32.mrb[2].mxu1 }
 0x200   :  { %v398_v14 = vmax.f32 %v392_v10, 0.0  ;;  %v396_v15 = vpop.f32.mrb[3].mxu1 }
 0x201   :  { %v399_v16 = vmax.f32 %v394_v12, 0.0 }
 0x202   :  { %v400_v18 = vpack.c.bf16 %v398_v14, %v398_v14 }
 0x203   :  { %v401_v17 = vpack.c.bf16 %v399_v16, %v399_v16 }
 0x205   :  { %567 = vmatprep.mubr.bf16.mxu0 %v401_v17 }
 0x206   :  { %568 = vmatmul.mubr.bf16.vlgmr.msra.gmra.mrb[4].mxu0 %v400_v18 }
 0x2d9   :  { %v667_v19 = vpop.f32.mrb[4].mxu0 }
 0x2da   :  { %v668_v21 = vpop.f32.mrb[5].mxu0 }
 0x2db   :  { %v669_v22 = vadd.f32 %v668_v21, %v667_v19  ;;  %v670_v23 = vpop.f32.mrb[6].mxu0 }
 0x2dc   :  { %v671_v24 = vpop.f32.mrb[7].mxu0 }
 0x2dd   :  { %v570_v25 = vadd.f32 %v669_v22, %v632_v20 }
 0x2df   :  { %749 = vtanh.f32 %v570_v25 }
 0x2e9   :  { %v750_v27 = vpop.eup %749 }
 0x2ea   :  { %v581_v29 = vmul.f32 %v750_v27, %v649_v26 }
 0x2ec   :  { %v587_v30 = vadd.f32 %v650_v28, %v581_v29 }
 0x2ee   :  { %588 = vst [vmem:[%s967_s6] sm:$0xff] %v587_v30 }
 0x2ef   :  { %593 = vsyncpa [#allocation3], 1 }
 0x2f0   :  { %594 = vsyncpa [#allocation5], 1 }
 0x2f1   :  { %595 = vsyncpa [#allocation8], 1 }

</bundles_post_ra>
